<compile_context>
chip_gen: v6e
topology: v6e:2x2x1
jax: 0.10.0
libtpu: 0.0.40
codegen_flags: <defaults>
</compile_context>

<pallas_src>
import functools

import jax
import jax.numpy as jnp
from jax.experimental import pallas as pl
from jax.experimental.pallas import tpu as pltpu


def _round_up(x, m):
    return ((x + m - 1) // m) * m


# ----------------------------------------------------------------------------
# Pallas kernel: gather(via multi-hot matmul) -> (xW1+b1) -> ReLU -> (hW2+b2) -> sigmoid
# ----------------------------------------------------------------------------
def _entitycat_fused_kernel(idx_ref, emb_ref, w1_ref, b1_ref, w2_ref, b2_ref, o_ref,
                            *, row_offsets):
    tb = idx_ref.shape[0]
    ni_pad = emb_ref.shape[0]

    idx = idx_ref[...]                                            # (TB, C) int32
    iota = jax.lax.broadcasted_iota(jnp.int32, (tb, ni_pad), 1)   # lane index
    onehot = jnp.zeros((tb, ni_pad), dtype=jnp.float32)
    for c, off in enumerate(row_offsets):                         # C is tiny & static
        col = idx[:, c:c + 1] + off                               # (TB, 1), offset into combined table
        onehot = onehot + (iota == col).astype(jnp.float32)

    # embedding gather + concat == one MXU matmul against the block-diagonal combined table
    x = jnp.dot(onehot.astype(jnp.bfloat16), emb_ref[...],
                preferred_element_type=jnp.float32)               # (TB, F_PAD) f32 (exact)

    h = jnp.dot(x.astype(jnp.bfloat16), w1_ref[...],
                preferred_element_type=jnp.float32) + b1_ref[...] # (TB, H_PAD)
    h = jnp.maximum(h, 0.0)                                       # ReLU (f32, VPU)
    # Dropout == identity at inference time.

    y = jnp.dot(h.astype(jnp.bfloat16), w2_ref[...],
                preferred_element_type=jnp.float32) + b2_ref[...] # (TB, O_PAD)
    o_ref[...] = jax.nn.sigmoid(y)                                # lane-dense 128-wide store


# ----------------------------------------------------------------------------
# Parameter packing: combined/zero-padded bf16 weights for the kernel
# ----------------------------------------------------------------------------
def pack_params(params, embedding_size, output_size):
    embeddings = params["embeddings"]
    w1_t, b1, w2_t, b2 = params["w1_t"], params["b1"], params["w2_t"], params["b2"]

    NI = sum(ni for ni, _ in embedding_size)
    F = sum(nf for _, nf in embedding_size)
    H = w1_t.shape[1]
    O = output_size
    NI_PAD, F_PAD, H_PAD, O_PAD = (_round_up(d, 128) for d in (NI, F, H, O))

    # Block-diagonal combined embedding table: row-block c holds table c, placed at its
    # concat column offset, so multi-hot @ table == concat(gather(table_c, idx_c)).
    emb_comb = jnp.zeros((NI_PAD, F_PAD), jnp.float32)
    row_offsets = []
    r = c = 0
    for tbl, (ni, nf) in zip(embeddings, embedding_size):
        row_offsets.append(r)
        emb_comb = emb_comb.at[r:r + ni, c:c + nf].set(tbl)
        r += ni
        c += nf

    def pad2(a, rr, cc):
        return jnp.pad(a, ((0, rr - a.shape[0]), (0, cc - a.shape[1])))

    return {
        "emb_pad": emb_comb.astype(jnp.bfloat16),                       # (NI_PAD, F_PAD)
        "w1_pad": pad2(w1_t, F_PAD, H_PAD).astype(jnp.bfloat16),        # (F_PAD, H_PAD)
        "b1_pad": pad2(b1, 1, H_PAD),                                   # (1, H_PAD) f32
        "w2_pad": pad2(w2_t, H_PAD, O_PAD).astype(jnp.bfloat16),        # (H_PAD, O_PAD)
        "b2_pad": pad2(b2, 1, O_PAD),                                   # (1, O_PAD) f32
        "row_offsets": tuple(row_offsets),
        "dims": {"NI_PAD": NI_PAD, "F_PAD": F_PAD, "H_PAD": H_PAD, "O_PAD": O_PAD, "O": O},
    }


# ----------------------------------------------------------------------------
# Full EntityCat forward
# ----------------------------------------------------------------------------
def entitycat_forward(packed, x_categorical, *, tb=128):
    """x_categorical: (B, num_cat_cols) int.  Returns (B, output_size) f32."""
    d = packed["dims"]
    B, C = x_categorical.shape
    assert C == len(packed["row_offsets"]), (
        "The number of features in the feature list and x_categorical shape should match")

    Bp = _round_up(B, tb)
    idx = x_categorical.astype(jnp.int32)
    if Bp != B:
        idx = jnp.pad(idx, ((0, Bp - B), (0, 0)))   # index 0 is always valid; rows sliced off

    kernel = functools.partial(_entitycat_fused_kernel, row_offsets=packed["row_offsets"])
    const = lambda i: (0, 0)

    flops = 2 * Bp * (d["NI_PAD"] * d["F_PAD"] + d["F_PAD"] * d["H_PAD"]
                      + d["H_PAD"] * d["O_PAD"])
    bytes_accessed = (idx.size * 4 + Bp * d["O_PAD"] * 4
                      + packed["emb_pad"].size * 2 + packed["w1_pad"].size * 2
                      + packed["w2_pad"].size * 2
                      + packed["b1_pad"].size * 4 + packed["b2_pad"].size * 4)

    out = pl.pallas_call(
        kernel,
        out_shape=jax.ShapeDtypeStruct((Bp, d["O_PAD"]), jnp.float32),
        grid=(Bp // tb,),
        in_specs=[
            pl.BlockSpec((tb, C), lambda i: (i, 0)),             # batch-tiled indices
            pl.BlockSpec((d["NI_PAD"], d["F_PAD"]), const),      # grid-invariant weights
            pl.BlockSpec((d["F_PAD"], d["H_PAD"]), const),
            pl.BlockSpec((1, d["H_PAD"]), const),
            pl.BlockSpec((d["H_PAD"], d["O_PAD"]), const),
            pl.BlockSpec((1, d["O_PAD"]), const),
        ],
        out_specs=pl.BlockSpec((tb, d["O_PAD"]), lambda i: (i, 0)),
        compiler_params=pltpu.CompilerParams(dimension_semantics=("parallel",)),
        cost_estimate=pl.CostEstimate(flops=flops,
                                      transcendentals=Bp * d["O_PAD"],
                                      bytes_accessed=bytes_accessed),
    )(idx, packed["emb_pad"], packed["w1_pad"], packed["b1_pad"],
      packed["w2_pad"], packed["b2_pad"])

    return out[:B, :d["O"]]


# ----------------------------------------------------------------------------
# Deterministic parameter construction (matches PyTorch module shapes/inits)
# ----------------------------------------------------------------------------
def init_params(key, embedding_size, num_numerical_cols, output_size, neurons_in_layers):
    assert len(neurons_in_layers) == 1, "single hidden layer for this fused kernel"
    hidden = neurons_in_layers[0]
    num_cat = sum(nf for _, nf in embedding_size)
    input_size = num_cat + num_numerical_cols

    keys = jax.random.split(key, len(embedding_size) + 4)

    # nn.Embedding weights: normal(std=0.01)
    embeddings = [
        0.01 * jax.random.normal(keys[i], (ni, nf), dtype=jnp.float32)
        for i, (ni, nf) in enumerate(embedding_size)
    ]

    # mlp Linear: xavier_normal_, weight (hidden, input_size); stored transposed for x @ W.
    xav_std = (2.0 / (input_size + hidden)) ** 0.5
    w1 = xav_std * jax.random.normal(keys[-4], (hidden, input_size), dtype=jnp.float32)
    b1_bound = 1.0 / (input_size ** 0.5)
    b1 = jax.random.uniform(keys[-3], (1, hidden), minval=-b1_bound, maxval=b1_bound,
                            dtype=jnp.float32)

    # predict Linear: kaiming_normal_(a=1) -> gain = sqrt(2/(1+1)) = 1, std = 1/sqrt(fan_in)
    km_std = 1.0 / (hidden ** 0.5)
    w2 = km_std * jax.random.normal(keys[-2], (output_size, hidden), dtype=jnp.float32)
    b2_bound = 1.0 / (hidden ** 0.5)
    b2 = jax.random.uniform(keys[-1], (1, output_size), minval=-b2_bound, maxval=b2_bound,
                            dtype=jnp.float32)

    return {
        "embeddings": embeddings,
        "w1_t": w1.T,        # (input_size, hidden)
        "b1": b1,            # (1, hidden)
        "w2_t": w2.T,        # (hidden, output_size)
        "b2": b2,            # (1, output_size)
    }


if __name__ == "__main__":
    key = jax.random.PRNGKey(0)

    # Small shapes consistent with the module's forward():
    embedding_size = [(10, 8), (7, 8), (5, 16)]   # -> concat feature dim F = 32
    num_numerical_cols = 0                        # forward() never concatenates numericals
    output_size = 4
    neurons_in_layers = [64]
    B = 200                                       # not a tile multiple -> exercises padding
    TB = 128

    k_param, k_data = jax.random.split(key)
    params = init_params(k_param, embedding_size, num_numerical_cols,
                         output_size, neurons_in_layers)
    packed = pack_params(params, embedding_size, output_size)

    # x_categorical: (B, num_cat_cols) int indices, each within its table size.
    cols = []
    for i, (ni, _) in enumerate(embedding_size):
        cols.append(jax.random.randint(jax.random.fold_in(k_data, i), (B, 1), 0, ni))
    x_categorical = jnp.concatenate(cols, axis=1).astype(jnp.int32)   # (B, 3)

    out = entitycat_forward(packed, x_categorical, tb=TB)
    out = jax.block_until_ready(out)
    assert out.shape == (B, output_size)

    # Reference 1: same precision contract as the kernel (bf16 matmul inputs, f32 accum).
    emb_bf = [t.astype(jnp.bfloat16) for t in params["embeddings"]]
    x_cat = jnp.concatenate(
        [jnp.take(t, x_categorical[:, i], axis=0) for i, t in enumerate(emb_bf)], axis=1)
    w1_bf = params["w1_t"].astype(jnp.bfloat16)
    w2_bf = params["w2_t"].astype(jnp.bfloat16)
    h_ref = jnp.maximum(
        jnp.dot(x_cat, w1_bf, preferred_element_type=jnp.float32) + params["b1"], 0.0)
    y_ref = jax.nn.sigmoid(
        jnp.dot(h_ref.astype(jnp.bfloat16), w2_bf, preferred_element_type=jnp.float32)
        + params["b2"])
    assert jnp.allclose(out, y_ref, atol=1e-4, rtol=1e-4)

    # Reference 2: full-f32 math (PyTorch-equivalent), loose tolerance for bf16 operands.
    x_f32 = jnp.concatenate(
        [jnp.take(t, x_categorical[:, i], axis=0) for i, t in enumerate(params["embeddings"])],
        axis=1)
    h_f32 = jnp.maximum(x_f32 @ params["w1_t"] + params["b1"], 0.0)
    y_f32 = jax.nn.sigmoid(h_f32 @ params["w2_t"] + params["b2"])
    assert jnp.allclose(out, y_f32, atol=5e-3, rtol=5e-3)

    print("KERNEL_OK")
</pallas_src>

<mosaic_0001>
module attributes {stable_mosaic.version = 11 : i64} {
  func.func @_entitycat_fused_kernel(%arg0: i32, %arg1: memref<128x3xi32, #tpu.memory_space<vmem>>, %arg2: memref<128x128xbf16, #tpu.memory_space<vmem>>, %arg3: memref<128x128xbf16, #tpu.memory_space<vmem>>, %arg4: memref<1x128xf32, #tpu.memory_space<vmem>>, %arg5: memref<128x128xbf16, #tpu.memory_space<vmem>>, %arg6: memref<1x128xf32, #tpu.memory_space<vmem>>, %arg7: memref<128x128xf32, #tpu.memory_space<vmem>>) attributes {dimension_semantics = [#tpu.dimension_semantics<parallel>], iteration_bounds = array<i64: 2>, scalar_prefetch = 0 : i64, scratch_operands = 0 : i64, tpu.core_type = #tpu.core_type<tc>, window_params = [{transform_indices = @transform_0, window_bounds = array<i64: 128, 3>}, {pipeline_mode = #tpu.pipeline_mode<synchronous>, transform_indices = @transform_1, window_bounds = array<i64: 128, 128>}, {pipeline_mode = #tpu.pipeline_mode<synchronous>, transform_indices = @transform_2, window_bounds = array<i64: 128, 128>}, {pipeline_mode = #tpu.pipeline_mode<synchronous>, transform_indices = @transform_3, window_bounds = array<i64: 1, 128>}, {pipeline_mode = #tpu.pipeline_mode<synchronous>, transform_indices = @transform_4, window_bounds = array<i64: 128, 128>}, {pipeline_mode = #tpu.pipeline_mode<synchronous>, transform_indices = @transform_5, window_bounds = array<i64: 1, 128>}, {transform_indices = @transform_6, window_bounds = array<i64: 128, 128>}]} {
    %c0 = arith.constant 0 : index
    %c0_0 = arith.constant 0 : index
    %0 = vector.load %arg1[%c0, %c0_0] : memref<128x3xi32, #tpu.memory_space<vmem>>, vector<128x3xi32>
    %1 = tpu.iota {dimensions = array<i32: 1>} : vector<128x128xi32>
    %cst = arith.constant 0.000000e+00 : f32
    %2 = vector.broadcast %cst : f32 to vector<128x128xf32>
    %3 = vector.extract_strided_slice %0 {offsets = [0, 0], sizes = [128, 1], strides = [1, 1]} : vector<128x3xi32> to vector<128x1xi32>
    %c0_i32 = arith.constant 0 : i32
    %4 = vector.broadcast %c0_i32 : i32 to vector<128x1xi32>
    %5 = arith.addi %3, %4 : vector<128x1xi32>
    %6 = vector.broadcast %5 : vector<128x1xi32> to vector<128x128xi32>
    %7 = arith.cmpi eq, %1, %6 : vector<128x128xi32>
    %8 = arith.extui %7 : vector<128x128xi1> to vector<128x128xi32>
    %9 = arith.sitofp %8 : vector<128x128xi32> to vector<128x128xf32>
    %10 = arith.addf %2, %9 : vector<128x128xf32>
    %11 = vector.extract_strided_slice %0 {offsets = [0, 1], sizes = [128, 1], strides = [1, 1]} : vector<128x3xi32> to vector<128x1xi32>
    %c10_i32 = arith.constant 10 : i32
    %12 = vector.broadcast %c10_i32 : i32 to vector<128x1xi32>
    %13 = arith.addi %11, %12 : vector<128x1xi32>
    %14 = vector.broadcast %13 : vector<128x1xi32> to vector<128x128xi32>
    %15 = arith.cmpi eq, %1, %14 : vector<128x128xi32>
    %16 = arith.extui %15 : vector<128x128xi1> to vector<128x128xi32>
    %17 = arith.sitofp %16 : vector<128x128xi32> to vector<128x128xf32>
    %18 = arith.addf %10, %17 : vector<128x128xf32>
    %19 = vector.extract_strided_slice %0 {offsets = [0, 2], sizes = [128, 1], strides = [1, 1]} : vector<128x3xi32> to vector<128x1xi32>
    %c17_i32 = arith.constant 17 : i32
    %20 = vector.broadcast %c17_i32 : i32 to vector<128x1xi32>
    %21 = arith.addi %19, %20 : vector<128x1xi32>
    %22 = vector.broadcast %21 : vector<128x1xi32> to vector<128x128xi32>
    %23 = arith.cmpi eq, %1, %22 : vector<128x128xi32>
    %24 = arith.extui %23 : vector<128x128xi1> to vector<128x128xi32>
    %25 = arith.sitofp %24 : vector<128x128xi32> to vector<128x128xf32>
    %26 = arith.addf %18, %25 : vector<128x128xf32>
    %27 = arith.truncf %26 : vector<128x128xf32> to vector<128x128xbf16>
    %c0_1 = arith.constant 0 : index
    %c0_2 = arith.constant 0 : index
    %28 = vector.load %arg2[%c0_1, %c0_2] : memref<128x128xbf16, #tpu.memory_space<vmem>>, vector<128x128xbf16>
    %cst_3 = arith.constant dense<0.000000e+00> : vector<128x128xf32>
    %29 = tpu.matmul %27, %28, %cst_3 {dimension_numbers = #tpu.dot_dimension_numbers<[1], [0], [0], [1], [0, 0, 1, 1], [], []>} : vector<128x128xbf16>, vector<128x128xbf16>, vector<128x128xf32> -> vector<128x128xf32>
    %30 = arith.truncf %29 : vector<128x128xf32> to vector<128x128xbf16>
    %c0_4 = arith.constant 0 : index
    %c0_5 = arith.constant 0 : index
    %31 = vector.load %arg3[%c0_4, %c0_5] : memref<128x128xbf16, #tpu.memory_space<vmem>>, vector<128x128xbf16>
    %cst_6 = arith.constant dense<0.000000e+00> : vector<128x128xf32>
    %32 = tpu.matmul %30, %31, %cst_6 {dimension_numbers = #tpu.dot_dimension_numbers<[1], [0], [0], [1], [0, 0, 1, 1], [], []>} : vector<128x128xbf16>, vector<128x128xbf16>, vector<128x128xf32> -> vector<128x128xf32>
    %c0_7 = arith.constant 0 : index
    %c0_8 = arith.constant 0 : index
    %33 = vector.load %arg4[%c0_7, %c0_8] : memref<1x128xf32, #tpu.memory_space<vmem>>, vector<1x128xf32>
    %34 = vector.broadcast %33 : vector<1x128xf32> to vector<128x128xf32>
    %35 = arith.addf %32, %34 : vector<128x128xf32>
    %cst_9 = arith.constant 0.000000e+00 : f32
    %36 = vector.broadcast %cst_9 : f32 to vector<128x128xf32>
    %37 = arith.maximumf %35, %36 : vector<128x128xf32>
    %38 = arith.truncf %37 : vector<128x128xf32> to vector<128x128xbf16>
    %c0_10 = arith.constant 0 : index
    %c0_11 = arith.constant 0 : index
    %39 = vector.load %arg5[%c0_10, %c0_11] : memref<128x128xbf16, #tpu.memory_space<vmem>>, vector<128x128xbf16>
    %cst_12 = arith.constant dense<0.000000e+00> : vector<128x128xf32>
    %40 = tpu.matmul %38, %39, %cst_12 {dimension_numbers = #tpu.dot_dimension_numbers<[1], [0], [0], [1], [0, 0, 1, 1], [], []>} : vector<128x128xbf16>, vector<128x128xbf16>, vector<128x128xf32> -> vector<128x128xf32>
    %c0_13 = arith.constant 0 : index
    %c0_14 = arith.constant 0 : index
    %41 = vector.load %arg6[%c0_13, %c0_14] : memref<1x128xf32, #tpu.memory_space<vmem>>, vector<1x128xf32>
    %42 = vector.broadcast %41 : vector<1x128xf32> to vector<128x128xf32>
    %43 = arith.addf %40, %42 : vector<128x128xf32>
    %44 = arith.negf %43 : vector<128x128xf32>
    %45 = math.exp %44 : vector<128x128xf32>
    %cst_15 = arith.constant 1.000000e+00 : f32
    %46 = vector.broadcast %cst_15 : f32 to vector<128x128xf32>
    %47 = arith.addf %46, %45 : vector<128x128xf32>
    %48 = arith.divf %46, %47 : vector<128x128xf32>
    %c0_16 = arith.constant 0 : index
    %c0_17 = arith.constant 0 : index
    %49 = vector.load %arg7[%c0_16, %c0_17] : memref<128x128xf32, #tpu.memory_space<vmem>>, vector<128x128xf32>
    tpu.vector_store %arg7[%c0_16, %c0_17], %48 {strides = array<i32>} : memref<128x128xf32, #tpu.memory_space<vmem>>, vector<128x128xf32>,
    return
  }
  func.func @transform_0(%arg0: i32) -> (i32, i32) {
    %c0_i32 = arith.constant 0 : i32
    %c0_i32_0 = arith.constant 0 : i32
    return %arg0, %c0_i32 : i32, i32
  }
  func.func @transform_1(%arg0: i32) -> (i32, i32) {
    %c0_i32 = arith.constant 0 : i32
    %c0_i32_0 = arith.constant 0 : i32
    %c0_i32_1 = arith.constant 0 : i32
    return %c0_i32, %c0_i32_0 : i32, i32
  }
  func.func @transform_2(%arg0: i32) -> (i32, i32) {
    %c0_i32 = arith.constant 0 : i32
    %c0_i32_0 = arith.constant 0 : i32
    %c0_i32_1 = arith.constant 0 : i32
    return %c0_i32, %c0_i32_0 : i32, i32
  }
  func.func @transform_3(%arg0: i32) -> (i32, i32) {
    %c0_i32 = arith.constant 0 : i32
    %c0_i32_0 = arith.constant 0 : i32
    %c0_i32_1 = arith.constant 0 : i32
    return %c0_i32, %c0_i32_0 : i32, i32
  }
  func.func @transform_4(%arg0: i32) -> (i32, i32) {
    %c0_i32 = arith.constant 0 : i32
    %c0_i32_0 = arith.constant 0 : i32
    %c0_i32_1 = arith.constant 0 : i32
    return %c0_i32, %c0_i32_0 : i32, i32
  }
  func.func @transform_5(%arg0: i32) -> (i32, i32) {
    %c0_i32 = arith.constant 0 : i32
    %c0_i32_0 = arith.constant 0 : i32
    %c0_i32_1 = arith.constant 0 : i32
    return %c0_i32, %c0_i32_0 : i32, i32
  }
  func.func @transform_6(%arg0: i32) -> (i32, i32) {
    %c0_i32 = arith.constant 0 : i32
    %c0_i32_0 = arith.constant 0 : i32
    return %arg0, %c0_i32 : i32, i32
  }
}

</mosaic_0001>

<bundles_post_ra>
// kernel: tpu_custom_call.1
= control target key start
LH: loop header
LB: loop body
LE: loop exit
PB: predicated region body
PF: predicated region fallthrough
CT: control target
= control target key end

     0   :  { %11 = vsyncpa [#allocation3], 0  ;;  %s2286_s0 = inlined_call_operand.vmem [shape: s32[256,3], index: 0, kind: input, shape index: {}]   ;;  %s2287_s1 = inlined_call_operand.vmem [shape: bf16[128,128], index: 1, kind: input, shape index: {}]   ;;  %s2288_s2 = inlined_call_operand.vmem [shape: bf16[128,128], index: 2, kind: input, shape index: {}]   ;;  %s2289_s3 = inlined_call_operand.vmem [shape: f32[1,128], index: 3, kind: input, shape index: {}]   ;;  %s2290_s4 = inlined_call_operand.vmem [shape: bf16[128,128], index: 4, kind: input, shape index: {}]   ;;  %s2291_s5 = inlined_call_operand.vmem [shape: f32[1,128], index: 5, kind: input, shape index: {}]   ;;  %s2292_s6 = inlined_call_operand.hbm [shape: f32[256,128], index: 6, kind: output, shape index: {}]  }
   0x1   :  { %13 = vsyncpa [#allocation3 + $0x1], 0  ;;  %s1887_s21 = smov 0   ;;  %s1889_s22 = smov 0  }
   0x2   :  { %s1891_s23 = smov 0   ;;  %s1893_s24 = smov 0  }
   0x3 LB: > { %s1908_s25 = sadd.s32 4294967295, %s1843_s24   ;;  %s1365_s26 = sadd.s32 4294967294, %s1843_s24   ;;  %s1843_s24 = sphi %s1893_s24, %s2298_s24   ;;  %s1839_s23 = sphi %s1891_s23, %s2297_s23   ;;  %s1835_s22 = sphi %s1889_s22, %s2296_s22   ;;  %s1831_s21 = sphi %s1887_s21, %s2295_s21  }
   0x4   : > { %s1912_s27 = sadd.s32 1, %s1843_s24   ;;  %s157_s28 = sadd.s32 1, %s1839_s23 }
   0x5   : > { %s154_s29 = ssub.s32 %s1843_s24, %s1912_s27  ;;  %p167_p0 = scmp.ne.s32.totalorder %s1839_s23, %s1835_s22 }
   0x6   : > { %p155_p1 = scmp.eq.s32.totalorder %s154_s29, 0  ;;  %p168_p2 = scmp.eq.s32.totalorder %s1908_s25, 1 }
   0x7   : > { %p173_p3 = scmp.ne.s32.totalorder %s1835_s22, %s1831_s21  ;;  %p174_p4 = scmp.eq.s32.totalorder %s1365_s26, 1 }
   0x8   : > { %s1923_s30 = scalar_select %p155_p1, %s1839_s23, %s157_s28  }
   0x9   : > { %p1925_p5 = por %p168_p2, %p167_p0  ;;  %p1929_p6 = por %p174_p4, %p173_p3 }
   0xa   : > { %p1368_p7 = scmp.ge.s32.totalorder %s1843_s24, 1  ;;  %p216_p8 = scmp.lt.s32.totalorder %s1843_s24, 3 }
   0xc   : > { %p217_p9 = pnand %p1368_p7, %p216_p8 }
   0xd   : > { %s1370_s9 = sshll.u32 (!%p217_p9), %s1908_s25, 4  ;;  %s243_s26 = sand.u32 (!%p217_p9), 1, %s1835_s22  }
   0xe   : > { %220 = sbr.rel (%p217_p9) target bundleno = 937 (0x3a9), region = 44  ;;  %p247_p10 = scmp.lt.s32.totalorder (!%p217_p9), %s1370_s9, 31 }
   0xf   : > { %s1369_s28 = sshll.u32 (!%p217_p9), %s243_s26, 7  ;;  %s2246_s15 = scalar_lea.sflag (!%p217_p9), [#allocation3], %s243_s26 }
  0x10   : > { %s2209_s29 = scalar_lea.vmem (!%p217_p9), [#allocation2], %s1369_s28 }
  0x13   : > { %v1845_v0 = vmov 0   ;;  %v1846_v1 = vmov 2   ;;  %s2300_s9 = smov (!%p247_p10, %s1370_s9), 31  ;;  %v1847_v10 = vmov 1   ;;  %v1695_v19 = vld [vmem:[%s2287_s1 + $0x38] sm:$0xff]   ;;  %v1696_v21 = vld [vmem:[%s2287_s1 + $0x30] sm:$0xff]  }
  0x14   : > { %1673 = vset.pattern.permute.xlu1 %v1845_v0  ;;  %1676 = vset.pattern.permute.xlu0 %v1846_v1  ;;  %s1371_s10 = sshll.u32 %s2300_s9, 3  ;;  %v1697_v22 = vld [vmem:[%s2287_s1 + $0x28] sm:$0xff]   ;;  %v1698_v24 = vld [vmem:[%s2287_s1 + $0x20] sm:$0xff]   ;;  %v1699_v26 = vld [vmem:[%s2287_s1 + $0x18] sm:$0xff]   ;;  %s1467_s9 = sshll.u32 %s1908_s25, 11 }
  0x15   : > { %s1941_s13 = scalar_lea.vmem %s2286_s0, %s1371_s10  ;;  %1516 = vmatprep.subr.bf16.mxu0 %v1695_v19  ;;  %v1700_v29 = vld [vmem:[%s2287_s1 + $0x10] sm:$0xff]   ;;  %v1701_v31 = vld [vmem:[%s2287_s1 + $0x8] sm:$0xff]   ;;  %v1702_v34 = vld [vmem:[%s2287_s1] sm:$0xff]   ;;  %s1303_s10 = sshll.u32 %s2209_s29, 4  ;;  %s2240_s10 = int_to_ptr.vmem [resolvable:$true] %s1303_s10 }
  0x16   : > { %v257_v2 = vld [vmem:[%s1941_s13 + $0x18] sm:$0xff]  ;;  %v255_v3 = vld [vmem:[%s1941_s13 + $0x8] sm:$0xff]  ;;  %v254_v4 = vld [vmem:[%s1941_s13] sm:$0xff]  ;;  %1517 = vmatpush3.bf16.msra.mxu0 %v1695_v19  ;;  %s2238_s14 = scalar_lea.hbm %s2292_s6, %s1467_s9  ;;  %s1783_s25 = scalar_lea.vmem %s2240_s10, 2048 }
  0x17   : > { %282 = vperm.xlu1 %1673, %v257_v2   ;;  %v513_v5 = vadd.s32 17, %v255_v3  ;;  %v258_v6 = vld [vmem:[%s1941_s13 + $0x20] sm:$0xff]  ;;  %v384_v7 = vadd.s32 10, %v254_v4  ;;  %v1948_v9 = vld [vmem:[%s1941_s13 + $0x38] sm:$0xff]  ;;  %v385_v11 = vadd.s32 10, %v255_v3  ;;  %v1952_v12 = vld [vmem:[%s1941_s13 + $0x48] sm:$0xff]  ;;  %1518 = vmatprep.subr.bf16.mxu0 %v1696_v21  ;;  %p1784_p11 = scmp.ne.s32.totalorder %s2240_s10, %s1783_s25 }
  0x18   : > { %v516_v8 = vadd.s32 17, %v258_v6  ;;  %v519_v13 = vadd.s32 17, %v1948_v9  ;;  %v387_v14 = vadd.s32 10, %v257_v2  ;;  %v521_v15 = vadd.s32 17, %v1952_v12  ;;  %v256_v17 = vld [vmem:[%s1941_s13 + $0x10] sm:$0xff]  ;;  %v259_v23 = vld [vmem:[%s1941_s13 + $0x28] sm:$0xff] }
  0x19   : > { %532 = vperm.xlu0 %1676, %v513_v5   ;;  %v512_v16 = vadd.s32 17, %v254_v4  ;;  %v514_v18 = vadd.s32 17, %v256_v17  ;;  %v515_v20 = vadd.s32 17, %v257_v2  ;;  %v388_v25 = vadd.s32 10, %v258_v6  ;;  %v1979_v27 = vld [vmem:[%s1941_s13 + $0x50] sm:$0xff]  ;;  %v1988_v30 = vld [vmem:[%s1941_s13 + $0x60] sm:$0xff]  ;;  %p1785_p12 = pnand %p1784_p11, %p1925_p5 }
  0x1a   : > { %1519 = vmatpush3.bf16.msra.mxu0 %v1696_v21  ;;  %v260_v28 = vld [vmem:[%s1941_s13 + $0x30] sm:$0xff]  ;;  %v386_v32 = vadd.s32 10, %v256_v17  ;;  %v391_v33 = vadd.s32 10, %v1948_v9  ;;  %v389_v35 = vadd.s32 10, %v259_v23  ;;  %v517_v36 = vadd.s32 17, %v259_v23  ;;  %v267_v40 = vld [vmem:[%s1941_s13 + $0x68] sm:$0xff] }
  0x1b   : > { %1674 = vset.pattern.permute.xlu1 %v1847_v10  ;;  %1520 = vmatprep.subr.bf16.mxu0 %v1697_v22  ;;  %v390_v37 = vadd.s32 10, %v260_v28  ;;  %v518_v38 = vadd.s32 17, %v260_v28  ;;  %v394_v39 = vadd.s32 10, %v1979_v27  ;;  %v397_v41 = vadd.s32 10, %v267_v40  ;;  %v262_v42 = vld [vmem:[%s1941_s13 + $0x40] sm:$0xff]  ;;  %v268_v43 = vld [vmem:[%s1941_s13 + $0x70] sm:$0xff]  ;;  %p1786_p13 = pneg %p1785_p12 }
  0x1c   : > { %401 = vperm.xlu1 %1674, %v384_v7   ;;  %v398_v44 = vadd.s32 10, %v268_v43  ;;  %v392_v45 = vadd.s32 10, %v262_v42  ;;  %v393_v46 = vadd.s32 10, %v1952_v12  ;;  %v524_v47 = vadd.s32 17, %v1988_v30  ;;  %v269_v48 = vld [vmem:[%s1941_s13 + $0x78] sm:$0xff]  ;;  %v1706_v7 = vld [vmem:[%s2288_s2 + $0x20] sm:$0xff]  }
  0x1d   : > { %541 = vperm.xlu0 %1676, %v516_v8   ;;  %v527_v49 = vadd.s32 17, %v269_v48  ;;  %v265_v50 = vld [vmem:[%s1941_s13 + $0x58] sm:$0xff]  ;;  %v520_v52 = vadd.s32 17, %v262_v42  ;;  %v522_v53 = vadd.s32 17, %v1979_v27  ;;  %v396_v55 = vadd.s32 10, %v1988_v30  ;;  %s1849_s13 = smov [#allocation2]  }
  0x1e   : > { %1521 = vmatpush3.bf16.msra.mxu0 %v1697_v22  ;;  %v395_v51 = vadd.s32 10, %v265_v50  ;;  %v523_v54 = vadd.s32 17, %v265_v50  ;;  %v399_v56 = vadd.s32 10, %v269_v48  ;;  %v525_v57 = vadd.s32 17, %v267_v40  ;;  %v1703_v63 = vld [vmem:[%s2288_s2 + $0x38] sm:$0xff]   ;;  %s1787_s16 = sshll.u32 %s1849_s13, 4  ;;  %s1788_s16 = int_to_ptr.vmem [resolvable:$false] %s1787_s16 }
  0x1f   : > { %1522 = vmatprep.subr.bf16.mxu0 %v1698_v24  ;;  %v526_v60 = vadd.s32 17, %v268_v43  ;;  %1548 = vmatprep.subr.bf16.mxu1 %v1703_v63  ;;  %v270_v5 = vlaneseq  ;;  %s1789_s17 = scalar_lea.vmem %s1788_s16, 4096  ;;  %p1790_p0 = scmp.lt.s32.totalorder %s2240_s10, %s1788_s16 }
  0x20   : > { %404 = vperm.xlu1 %1674, %v385_v11   ;;  %1549 = vmatpush3.bf16.msra.mxu1 %v1703_v63  ;;  %v1707_v11 = vld [vmem:[%s2288_s2 + $0x18] sm:$0xff]   ;;  %p1791_p1 = scmp.lt.s32.totalorder %s1789_s17, %s1783_s25 }
  0x21   : > { %550 = vperm.xlu0 %1676, %v519_v13   ;;  %v2043_v8 = vand.u32 127, %v270_v5 }
  0x22   : > { %1523 = vmatpush3.bf16.msra.mxu0 %v1698_v24  ;;  %p1792_p2 = por %p1791_p1, %p1790_p0 }
  0x23   : > { %1524 = vmatprep.subr.bf16.mxu0 %v1699_v26 }
  0x24   : > { %410 = vperm.xlu1 %1674, %v387_v14   ;;  %p1793_p3 = pnand %p1792_p2, %p1786_p13 }
  0x25   : > { %556 = vperm.xlu0 %1676, %v521_v15  }
  0x26   : > { %1525 = vmatpush3.bf16.msra.mxu0 %v1699_v26 }
  0x27   : > { %1526 = vmatprep.subr.bf16.mxu0 %v1700_v29 }
  0x28   : > { %1675 = vset.pattern.permute.xlu1 %v1846_v1 }
  0x29   : > { %1687 = vset.pattern.permute.xlu0 %v1845_v0  ;;  %529 = vperm.xlu1 %1675, %v512_v16  }
  0x2a   : > { %273 = vperm.xlu0 %1687, %v254_v4   ;;  %1527 = vmatpush3.bf16.msra.mxu0 %v1700_v29 }
  0x2b   : > { %1528 = vmatprep.subr.bf16.mxu0 %v1701_v31 }
  0x2d   : > { %535 = vperm.xlu1 %1675, %v514_v18   ;;  %v1708_v18 = vld [vmem:[%s2288_s2 + $0x10] sm:$0xff]  }
  0x2e   : > { %276 = vperm.xlu0 %1687, %v255_v3   ;;  %1529 = vmatpush3.bf16.msra.mxu0 %v1701_v31 }
  0x2f   : > { %1530 = vmatprep.subr.bf16.mxu0 %v1702_v34 }
  0x31   : > { %538 = vperm.xlu1 %1675, %v515_v20  }
  0x32   : > { %279 = vperm.xlu0 %1687, %v256_v17   ;;  %1531 = vmatpush3.bf16.msra.mxu0 %v1702_v34 }
  0x35   : > { %1677 = vset.pattern.permute.xlu1 %v1845_v0 }
  0x36   : > { %285 = vperm.xlu0 %1687, %v258_v6   ;;  %288 = vperm.xlu1 %1677, %v259_v23  }
  0x3a   : > { %300 = vperm.xlu0 %1687, %v1952_v12   ;;  %1678 = vset.pattern.permute.xlu1 %v1847_v10  ;;  %v1848_v12 = vmov 0.0  }
  0x3b   : > { %413 = vperm.xlu1 %1678, %v388_v25  }
  0x3e   : > { %303 = vperm.xlu0 %1687, %v1979_v27  }
  0x3f   : > { %1679 = vset.pattern.permute.xlu1 %v1845_v0 }
  0x40   : > { %291 = vperm.xlu1 %1679, %v260_v28  }
  0x42   : > { %309 = vperm.xlu0 %1687, %v1988_v30  }
  0x44   : > { %294 = vperm.xlu1 %1679, %v1948_v9  }
  0x46   : > { %1688 = vset.pattern.permute.xlu0 %v1847_v10 }
  0x47   : > { %407 = vperm.xlu0 %1688, %v386_v32  }
  0x48   : > { %1680 = vset.pattern.permute.xlu1 %v1847_v10 }
  0x49   : > { %422 = vperm.xlu1 %1680, %v391_v33  }
  0x4b   : > { %416 = vperm.xlu0 %1688, %v389_v35  }
  0x4d   : > { %1681 = vset.pattern.permute.xlu1 %v1846_v1 }
  0x4e   : > { %544 = vperm.xlu1 %1681, %v517_v36  }
  0x4f   : > { %419 = vperm.xlu0 %1688, %v390_v37  }
  0x52   : > { %547 = vperm.xlu1 %1681, %v518_v38  }
  0x53   : > { %431 = vperm.xlu0 %1688, %v394_v39  }
  0x56   : > { %1682 = vset.pattern.permute.xlu1 %v1845_v0 }
  0x57   : > { %297 = vperm.xlu1 %1682, %v262_v42   ;;  %440 = vperm.xlu0 %1688, %v397_v41  }
  0x5b   : > { %1683 = vset.pattern.permute.xlu1 %v1847_v10  ;;  %443 = vperm.xlu0 %1688, %v398_v44  }
  0x5c   : > { %425 = vperm.xlu1 %1683, %v392_v45  }
  0x5f   : > { %1693 = vset.pattern.permute.xlu0 %v1846_v1 }
  0x60   : > { %428 = vperm.xlu1 %1683, %v393_v46   ;;  %565 = vperm.xlu0 %1693, %v524_v47  }
  0x64   : > { %1684 = vset.pattern.permute.xlu1 %v1845_v0  ;;  %574 = vperm.xlu0 %1693, %v527_v49  }
  0x65   : > { %306 = vperm.xlu1 %1684, %v265_v50  }
  0x69   : > { %1685 = vset.pattern.permute.xlu1 %v1847_v10 }
  0x6a   : > { %434 = vperm.xlu1 %1685, %v395_v51  }
  0x6e   : > { %1686 = vset.pattern.permute.xlu1 %v1846_v1 }
  0x6f   : > { %553 = vperm.xlu1 %1686, %v520_v52  }
  0x73   : > { %559 = vperm.xlu1 %1686, %v522_v53  }
  0x77   : > { %562 = vperm.xlu1 %1686, %v523_v54  }
  0x7b   : > { %1689 = vset.pattern.permute.xlu1 %v1845_v0 }
  0x7c   : > { %312 = vperm.xlu1 %1689, %v267_v40  }
  0x80   : > { %1690 = vset.pattern.permute.xlu1 %v1847_v10 }
  0x81   : > { %437 = vperm.xlu1 %1690, %v396_v55  }
  0x85   : > { %1691 = vset.pattern.permute.xlu1 %v1845_v0  ;;  %v1704_v0 = vld [vmem:[%s2288_s2 + $0x30] sm:$0xff]  }
  0x86   : > { %315 = vperm.xlu1 %1691, %v268_v43   ;;  %1550 = vmatprep.subr.bf16.mxu1 %v1704_v0 }
  0x87   : > { %1551 = vmatpush3.bf16.msra.mxu1 %v1704_v0 }
  0x8a   : > { %318 = vperm.xlu1 %1691, %v269_v48  }
  0x8e   : > { %1692 = vset.pattern.permute.xlu1 %v1847_v10 }
  0x8f   : > { %446 = vperm.xlu1 %1692, %v399_v56  }
  0x92   : > { %v2022_v58 = vpop.permute.xlu1 %282 }
  0x93   : > { %1694 = vset.pattern.permute.xlu1 %v1846_v1  ;;  %v1705_v1 = vld [vmem:[%s2288_s2 + $0x28] sm:$0xff]   ;;  %vm323_vm8 = vcmp.eq.s32.totalorder %v2043_v8, %v2022_v58 }
  0x94   : > { %568 = vperm.xlu1 %1694, %v525_v57   ;;  %v533_v59 = vpop.permute.xlu0 %532  ;;  %1552 = vmatprep.subr.bf16.mxu1 %v1705_v1  ;;  %v1375_v40 = vsel %vm323_vm8, 1.0, %v1848_v12 }
  0x95   : > { %1553 = vmatpush3.bf16.msra.mxu1 %v1705_v1  ;;  %vm577_vm2 = vcmp.eq.s32.totalorder %v2043_v8, %v533_v59 }
  0x96   : > { %1554 = vmatprep.subr.bf16.mxu1 %v1706_v7  ;;  %v1405_v19 = vsel %vm577_vm2, 1.0, %v1848_v12 }
  0x97   : > { %v402_v61 = vpop.permute.xlu1 %401 }
  0x98   : > { %571 = vperm.xlu1 %1694, %v526_v60   ;;  %v2025_v62 = vpop.permute.xlu0 %541  ;;  %vm448_vm0 = vcmp.eq.s32.totalorder %v2043_v8, %v402_v61 }
  0x99   : > { %v1388_v15 = vsel %vm448_vm0, 1.0, %v1848_v12  ;;  %1555 = vmatpush3.bf16.msra.mxu1 %v1706_v7  ;;  %vm580_vm14 = vcmp.eq.s32.totalorder %v2043_v8, %v2025_v62 }
  0x9a   : > { %1556 = vmatprep.subr.bf16.mxu1 %v1707_v11  ;;  %v1408_v53 = vsel %vm580_vm14, 1.0, %v1848_v12 }
  0x9b   : > { %v405_v2 = vpop.permute.xlu1 %404 }
  0x9c   : > { %v2033_v3 = vpop.permute.xlu0 %550  ;;  %vm449_vm3 = vcmp.eq.s32.totalorder %v2043_v8, %v405_v2 }
  0x9d   : > { %v1389_v20 = vsel %vm449_vm3, 1.0, %v1848_v12  ;;  %1557 = vmatpush3.bf16.msra.mxu1 %v1707_v11 }
  0x9e   : > { %1558 = vmatprep.subr.bf16.mxu1 %v1708_v18 }
  0x9f   : > { %v411_v4 = vpop.permute.xlu1 %410 }
  0xa0   : > { %v2038_v6 = vpop.permute.xlu0 %556  ;;  %vm451_vm6 = vcmp.eq.s32.totalorder %v2043_v8, %v411_v4 }
  0xa1   : > { %1559 = vmatpush3.bf16.msra.mxu1 %v1708_v18  ;;  %v1391_v37 = vsel %vm451_vm6, 1.0, %v1848_v12 }
  0xa2   : > { %v499_v46 = vadd.f32 %v1391_v37, %v1375_v40 }
  0xa4   : > { %v530_v9 = vpop.permute.xlu1 %529 }
  0xa5   : > { %v274_v10 = vpop.permute.xlu0 %273  ;;  %vm576_vm4 = vcmp.eq.s32.totalorder %v2043_v8, %v530_v9 }
  0xa6   : > { %vm320_vm1 = vcmp.eq.s32.totalorder %v2043_v8, %v274_v10  ;;  %v1404_v24 = vsel %vm576_vm4, 1.0, %v1848_v12  ;;  %vm583_vm4 = vcmp.eq.s32.totalorder %v2043_v8, %v2033_v3 }
  0xa7   : > { %v1372_v13 = vsel %vm320_vm1, 1.0, %v1848_v12  ;;  %v1411_v5 = vsel %vm583_vm4, 1.0, %v1848_v12 }
  0xa8   : > { %v536_v14 = vpop.permute.xlu1 %535  ;;  %v496_v17 = vadd.f32 %v1388_v15, %v1372_v13 }
  0xa9   : > { %v277_v16 = vpop.permute.xlu0 %276  ;;  %vm578_vm12 = vcmp.eq.s32.totalorder %v2043_v8, %v536_v14 }
  0xaa   : > { %vm321_vm5 = vcmp.eq.s32.totalorder %v2043_v8, %v277_v16  ;;  %v624_v26 = vadd.f32 %v1404_v24, %v496_v17  ;;  %v1406_v48 = vsel %vm578_vm12, 1.0, %v1848_v12  ;;  %vm585_vm12 = vcmp.eq.s32.totalorder %v2043_v8, %v2038_v6 }
  0xab   : > { %v1373_v21 = vsel %vm321_vm5, 1.0, %v1848_v12 }
  0xac   : > { %v497_v22 = vadd.f32 %v1389_v20, %v1373_v21  ;;  %v539_v23 = vpop.permute.xlu1 %538 }
  0xad   : > { %v280_v25 = vpop.permute.xlu0 %279  ;;  %vm579_vm9 = vcmp.eq.s32.totalorder %v2043_v8, %v539_v23 }
  0xae   : > { %v625_v27 = vadd.f32 %v1405_v19, %v497_v22  ;;  %vm322_vm7 = vcmp.eq.s32.totalorder %v2043_v8, %v280_v25  ;;  %v1407_v41 = vsel %vm579_vm9, 1.0, %v1848_v12 }
  0xaf   : > { %v1374_v38 = vsel %vm322_vm7, 1.0, %v1848_v12  ;;  %v627_v50 = vadd.f32 %v1407_v41, %v499_v46 }
  0xb0   : > { %v640_v28 = vpack.c.bf16 %v625_v27, %v624_v26 }
  0xb1   : > { %v289_v29 = vpop.permute.xlu1 %288  ;;  %v286_v30 = vpop.permute.xlu0 %285 }
  0xb2   : > { %1532 = vmatprep.mubr.bf16.mxu0 %v640_v28  ;;  %vm324_vm10 = vcmp.eq.s32.totalorder %v2043_v8, %v286_v30  ;;  %vm325_vm15 = vcmp.eq.s32.totalorder %v2043_v8, %v289_v29  ;;  %v1413_v28 = vsel %vm585_vm12, 1.0, %v1848_v12 }
  0xb3   : > { %v1376_v42 = vsel %vm324_vm10, 1.0, %v1848_v12  ;;  %v1377_v54 = vsel %vm325_vm15, 1.0, %v1848_v12 }
  0xb5   : > { %v2063_v31 = vpop.permute.xlu0 %300 }
  0xb6   : > { %v414_v32 = vpop.permute.xlu1 %413  ;;  %vm329_vm9 = vcmp.eq.s32.totalorder %v2043_v8, %v2063_v31 }
  0xb7   : > { %vm452_vm11 = vcmp.eq.s32.totalorder %v2043_v8, %v414_v32  ;;  %v1381_v21 = vsel %vm329_vm9, 1.0, %v1848_v12 }
  0xb8   : > { %v1392_v43 = vsel %vm452_vm11, 1.0, %v1848_v12 }
  0xb9   : > { %v2065_v33 = vpop.permute.xlu0 %303  ;;  %v500_v51 = vadd.f32 %v1392_v43, %v1376_v42 }
  0xba   : > { %vm330_vm14 = vcmp.eq.s32.totalorder %v2043_v8, %v2065_v33 }
  0xbb   : > { %v292_v34 = vpop.permute.xlu1 %291  ;;  %v628_v61 = vadd.f32 %v1408_v53, %v500_v51 }
  0xbc   : > { %vm326_vm3 = vcmp.eq.s32.totalorder %v2043_v8, %v292_v34  ;;  %v1382_v34 = vsel %vm330_vm14, 1.0, %v1848_v12 }
  0xbd   : > { %v2067_v35 = vpop.permute.xlu0 %309  ;;  %v1378_v0 = vsel %vm326_vm3, 1.0, %v1848_v12 }
  0xbf   : > { %v295_v36 = vpop.permute.xlu1 %294 }
  0xc0   : > { %vm327_vm2 = vcmp.eq.s32.totalorder %v2043_v8, %v295_v36 }
  0xc1   : > { %v1379_v62 = vsel %vm327_vm2, 1.0, %v1848_v12 }
  0xc2   : > { %v408_v39 = vpop.permute.xlu0 %407 }
  0xc3   : > { %vm450_vm13 = vcmp.eq.s32.totalorder %v2043_v8, %v408_v39 }
  0xc4   : > { %v1390_v44 = vsel %vm450_vm13, 1.0, %v1848_v12  ;;  %v423_v45 = vpop.permute.xlu1 %422 }
  0xc5   : > { %v498_v47 = vadd.f32 %v1390_v44, %v1374_v38  ;;  %vm455_vm0 = vcmp.eq.s32.totalorder %v2043_v8, %v423_v45 }
  0xc6   : > { %v417_v49 = vpop.permute.xlu0 %416  ;;  %v1395_v56 = vsel %vm455_vm0, 1.0, %v1848_v12 }
  0xc7   : > { %v626_v52 = vadd.f32 %v1406_v48, %v498_v47  ;;  %vm453_vm1 = vcmp.eq.s32.totalorder %v2043_v8, %v417_v49  ;;  %v503_v2 = vadd.f32 %v1395_v56, %v1379_v62 }
  0xc8   : > { %v1393_v55 = vsel %vm453_vm1, 1.0, %v1848_v12 }
  0xc9   : > { %v501_v57 = vadd.f32 %v1393_v55, %v1377_v54  ;;  %v545_v58 = vpop.permute.xlu1 %544  ;;  %v641_v59 = vpack.c.bf16 %v627_v50, %v626_v52  ;;  %v631_v11 = vadd.f32 %v1411_v5, %v503_v2  ;;  %v1709_v55 = vld [vmem:[%s2288_s2 + $0x8] sm:$0xff]  }
  0xca   : > { %vm581_vm5 = vcmp.eq.s32.totalorder %v2043_v8, %v545_v58  ;;  %v420_v60 = vpop.permute.xlu0 %419  ;;  %1560 = vmatprep.subr.bf16.mxu1 %v1709_v55 }
  0xcb   : > { %v1409_v63 = vsel %vm581_vm5, 1.0, %v1848_v12  ;;  %vm454_vm6 = vcmp.eq.s32.totalorder %v2043_v8, %v420_v60  ;;  %1533 = vmatmul.mubr.bf16.vlgmr.msra.gmra.mxu0 %v641_v59  ;;  %vm332_vm5 = vcmp.eq.s32.totalorder %v2043_v8, %v2067_v35  ;;  %1561 = vmatpush3.bf16.msra.mxu1 %v1709_v55 }
  0xcc   : > { %v629_v1 = vadd.f32 %v1409_v63, %v501_v57  ;;  %v1394_v4 = vsel %vm454_vm6, 1.0, %v1848_v12  ;;  %v1384_v56 = vsel %vm332_vm5, 1.0, %v1848_v12  ;;  %v1710_v63 = vld [vmem:[%s2288_s2] sm:$0xff]  }
  0xcd   : > { %v502_v3 = vadd.f32 %v1394_v4, %v1378_v0  ;;  %v548_v7 = vpop.permute.xlu1 %547  ;;  %1562 = vmatprep.subr.bf16.mxu1 %v1710_v63 }
  0xce   : > { %vm582_vm7 = vcmp.eq.s32.totalorder %v2043_v8, %v548_v7  ;;  %v642_v9 = vpack.c.bf16 %v629_v1, %v628_v61  ;;  %v432_v25 = vpop.permute.xlu0 %431 }
  0xcf   : > { %v1410_v10 = vsel %vm582_vm7, 1.0, %v1848_v12  ;;  %vm458_vm15 = vcmp.eq.s32.totalorder %v2043_v8, %v432_v25  ;;  %1563 = vmatpush3.bf16.msra.mxu1 %v1710_v63 }
  0xd0   : > { %v630_v13 = vadd.f32 %v1410_v10, %v502_v3  ;;  %1536 = vmatprep.mubr.bf16.mxu0 %v642_v9  ;;  %v1398_v36 = vsel %vm458_vm15, 1.0, %v1848_v12 }
  0xd1   : > { %v506_v40 = vadd.f32 %v1398_v36, %v1382_v34 }
  0xd2   : > { %v298_v14 = vpop.permute.xlu1 %297  ;;  %v643_v15 = vpack.c.bf16 %v631_v11, %v630_v13  ;;  %v441_v48 = vpop.permute.xlu0 %440 }
  0xd3   : > { %vm328_vm11 = vcmp.eq.s32.totalorder %v2043_v8, %v298_v14  ;;  %vm461_vm6 = vcmp.eq.s32.totalorder %v2043_v8, %v441_v48 }
  0xd4   : > { %1537 = vmatmul.mubr.bf16.gmra.mxu0 %v643_v15  ;;  %v1380_v24 = vsel %vm328_vm11, 1.0, %v1848_v12  ;;  %v1401_v57 = vsel %vm461_vm6, 1.0, %v1848_v12 }
  0xd6   : > { %v444_v50 = vpop.permute.xlu0 %443 }
  0xd7   : > { %v426_v16 = vpop.permute.xlu1 %425  ;;  %vm462_vm12 = vcmp.eq.s32.totalorder %v2043_v8, %v444_v50 }
  0xd8   : > { %vm456_vm10 = vcmp.eq.s32.totalorder %v2043_v8, %v426_v16  ;;  %v1402_v9 = vsel %vm462_vm12, 1.0, %v1848_v12 }
  0xd9   : > { %v1396_v22 = vsel %vm456_vm10, 1.0, %v1848_v12 }
  0xda   : > { %v504_v27 = vadd.f32 %v1396_v22, %v1380_v24 }
  0xdb   : > { %v429_v17 = vpop.permute.xlu1 %428  ;;  %v566_v52 = vpop.permute.xlu0 %565 }
  0xdc   : > { %vm457_vm8 = vcmp.eq.s32.totalorder %v2043_v8, %v429_v17 }
  0xdd   : > { %v1397_v20 = vsel %vm457_vm8, 1.0, %v1848_v12  ;;  %vm588_vm8 = vcmp.eq.s32.totalorder %v2043_v8, %v566_v52 }
  0xde   : > { %v505_v23 = vadd.f32 %v1397_v20, %v1381_v21  ;;  %v1416_v60 = vsel %vm588_vm8, 1.0, %v1848_v12  ;;  %v1712_v20 = vld [vmem:[%s2290_s4 + $0x30] sm:$0xff]   ;;  %v1715_v21 = vld [vmem:[%s2290_s4 + $0x18] sm:$0xff]  }
  0xdf   : > { %v575_v58 = vpop.permute.xlu0 %574 }
  0xe0   : > { %v307_v18 = vpop.permute.xlu1 %306  ;;  %v633_v30 = vadd.f32 %v1413_v28, %v505_v23 }
  0xe1   : > { %vm331_vm1 = vcmp.eq.s32.totalorder %v2043_v8, %v307_v18 }
  0xe2   : > { %v1383_v37 = vsel %vm331_vm1, 1.0, %v1848_v12 }
  0xe5   : > { %v435_v19 = vpop.permute.xlu1 %434 }
  0xe6   : > { %vm459_vm0 = vcmp.eq.s32.totalorder %v2043_v8, %v435_v19  ;;  %v1711_v19 = vld [vmem:[%s2290_s4 + $0x38] sm:$0xff]  }
  0xe7   : > { %v1399_v33 = vsel %vm459_vm0, 1.0, %v1848_v12  ;;  %1580 = vmatprep.subr.bf16.mxu0 %v1711_v19  ;;  %1612 = vmatprep.subr.bf16.mxu1 %v1711_v19 }
  0xe8   : > { %v507_v41 = vadd.f32 %v1399_v33, %v1383_v37  ;;  %1581 = vmatpush3.bf16.msra.mxu0 %v1711_v19 }
  0xe9   : > { %1582 = vmatprep.subr.bf16.mxu0 %v1712_v20 }
  0xea   : > { %v554_v26 = vpop.permute.xlu1 %553 }
  0xeb   : > { %vm584_vm13 = vcmp.eq.s32.totalorder %v2043_v8, %v554_v26 }
  0xec   : > { %v1412_v29 = vsel %vm584_vm13, 1.0, %v1848_v12  ;;  %vm591_vm13 = vcmp.eq.s32.totalorder %v2043_v8, %v575_v58  ;;  %1583 = vmatpush3.bf16.msra.mxu0 %v1712_v20 }
  0xed   : > { %v632_v6 = vadd.f32 %v1412_v29, %v504_v27  ;;  %v1419_v10 = vsel %vm591_vm13, 1.0, %v1848_v12 }
  0xee   : > { %v560_v31 = vpop.permute.xlu1 %559 }
  0xef   : > { %vm586_vm2 = vcmp.eq.s32.totalorder %v2043_v8, %v560_v31  ;;  %v644_v32 = vpack.c.bf16 %v633_v30, %v632_v6 }
  0xf0   : > { %v1414_v38 = vsel %vm586_vm2, 1.0, %v1848_v12 }
  0xf1   : > { %1540 = vmatprep.mubr.bf16.mxu0 %v644_v32  ;;  %v634_v43 = vadd.f32 %v1414_v38, %v506_v40  ;;  %v1716_v40 = vld [vmem:[%s2290_s4 + $0x10] sm:$0xff]  }
  0xf2   : > { %v563_v39 = vpop.permute.xlu1 %562 }
  0xf3   : > { %vm587_vm3 = vcmp.eq.s32.totalorder %v2043_v8, %v563_v39 }
  0xf4   : > { %v1415_v42 = vsel %vm587_vm3, 1.0, %v1848_v12 }
  0xf5   : > { %v635_v44 = vadd.f32 %v1415_v42, %v507_v41  ;;  %v1717_v41 = vld [vmem:[%s2290_s4 + $0x8] sm:$0xff]  }
  0xf7   : > { %v313_v45 = vpop.permute.xlu1 %312  ;;  %v645_v46 = vpack.c.bf16 %v635_v44, %v634_v43  ;;  %v1718_v44 = vld [vmem:[%s2290_s4] sm:$0xff]  }
  0xf8   : > { %vm333_vm7 = vcmp.eq.s32.totalorder %v2043_v8, %v313_v45 }
  0xf9   : > { %1541 = vmatmul.mubr.bf16.gmra.mxu0 %v645_v46  ;;  %v1385_v35 = vsel %vm333_vm7, 1.0, %v1848_v12 }
  0xfa   : > { %v509_v0 = vadd.f32 %v1401_v57, %v1385_v35 }
  0xfc   : > { %v438_v47 = vpop.permute.xlu1 %437 }
  0xfd   : > { %vm460_vm4 = vcmp.eq.s32.totalorder %v2043_v8, %v438_v47 }
  0xfe   : > { %v1400_v54 = vsel %vm460_vm4, 1.0, %v1848_v12 }
  0xff   : > { %v508_v59 = vadd.f32 %v1400_v54, %v1384_v56 }
 0x101   : > { %v316_v49 = vpop.permute.xlu1 %315  ;;  %v636_v5 = vadd.f32 %v1416_v60, %v508_v59 }
 0x102   : > { %vm334_vm10 = vcmp.eq.s32.totalorder %v2043_v8, %v316_v49 }
 0x103   : > { %v1386_v2 = vsel %vm334_vm10, 1.0, %v1848_v12 }
 0x104   : > { %v510_v13 = vadd.f32 %v1402_v9, %v1386_v2 }
 0x105   : > { %v319_v51 = vpop.permute.xlu1 %318 }
 0x106   : > { %vm335_vm11 = vcmp.eq.s32.totalorder %v2043_v8, %v319_v51  ;;  %v1428_v51 = vld [vmem:[%s2289_s3] ss:$0 sm:$0xff] }
 0x107   : > { %v1387_v1 = vsel %vm335_vm11, 1.0, %v1848_v12 }
 0x10a   : > { %v447_v53 = vpop.permute.xlu1 %446 }
 0x10b   : > { %vm463_vm9 = vcmp.eq.s32.totalorder %v2043_v8, %v447_v53 }
 0x10c   : > { %v1403_v61 = vsel %vm463_vm9, 1.0, %v1848_v12 }
 0x10d   : > { %v511_v3 = vadd.f32 %v1403_v61, %v1387_v1 }
 0x10f   : > { %v569_v62 = vpop.permute.xlu1 %568  ;;  %v639_v16 = vadd.f32 %v1419_v10, %v511_v3 }
 0x110   : > { %vm589_vm14 = vcmp.eq.s32.totalorder %v2043_v8, %v569_v62 }
 0x111   : > { %v1417_v4 = vsel %vm589_vm14, 1.0, %v1848_v12 }
 0x112   : > { %v637_v7 = vadd.f32 %v1417_v4, %v509_v0 }
 0x113   : > { %v572_v11 = vpop.permute.xlu1 %571 }
 0x114   : > { %vm590_vm15 = vcmp.eq.s32.totalorder %v2043_v8, %v572_v11  ;;  %v646_v14 = vpack.c.bf16 %v637_v7, %v636_v5  ;;  %v1713_v8 = vld [vmem:[%s2290_s4 + $0x28] sm:$0xff]  }
 0x115   : > { %v1418_v15 = vsel %vm590_vm15, 1.0, %v1848_v12  ;;  %1584 = vmatprep.subr.bf16.mxu0 %v1713_v8  ;;  %v1714_v12 = vld [vmem:[%s2290_s4 + $0x20] sm:$0xff]  }
 0x116   : > { %v638_v17 = vadd.f32 %v1418_v15, %v510_v13  ;;  %1544 = vmatprep.mubr.bf16.mxu0 %v646_v14  ;;  %1585 = vmatpush3.bf16.msra.mxu0 %v1713_v8 }
 0x117   : > { %1586 = vmatprep.subr.bf16.mxu0 %v1714_v12 }
 0x118   : > { %v647_v18 = vpack.c.bf16 %v639_v16, %v638_v17 }
 0x11a   : > { %1545 = vmatmul.mubr.bf16.gmra.mxu0 %v647_v18 }
 0x11b   : > { %1587 = vmatpush3.bf16.msra.mxu0 %v1714_v12 }
 0x11c   : > { %1588 = vmatprep.subr.bf16.mxu0 %v1715_v21 }
 0x11f   : > { %1589 = vmatpush3.bf16.msra.mxu0 %v1715_v21 }
 0x120   : > { %1590 = vmatprep.subr.bf16.mxu0 %v1716_v40 }
 0x123   : > { %1591 = vmatpush3.bf16.msra.mxu0 %v1716_v40 }
 0x124   : > { %1592 = vmatprep.subr.bf16.mxu0 %v1717_v41 }
 0x127   : > { %1593 = vmatpush3.bf16.msra.mxu0 %v1717_v41 }
 0x128   : > { %1594 = vmatprep.subr.bf16.mxu0 %v1718_v44 }
 0x12b   : > { %1595 = vmatpush3.bf16.msra.mxu0 %v1718_v44 }
 0x18b   : > { %v1534_v22 = vpop.f32.mrf.mxu0 }
 0x18d   : > { %v746_v23 = vpop.f32.mrf.mxu0 }
 0x18f   : > { %v1535_v24 = vpop.f32.mrf.mxu0 }
 0x190   : > { %v810_v27 = vpack.c.bf16 %v1535_v24, %v1534_v22 }
 0x191   : > { %v749_v25 = vpop.f32.mrf.mxu0 }
 0x192   : > { %v809_v26 = vpack.c.bf16 %v749_v25, %v746_v23 }
 0x194   : > { %v1538_v28 = vpop.f32.mrf.mxu0  ;;  %1564 = vmatprep.mubr.bf16.mxu1 %v809_v26 }
 0x195   : > { %1565 = vmatmul.mubr.bf16.vlgmr.msra.gmra.mxu1 %v810_v27 }
 0x196   : > { %v762_v29 = vpop.f32.mrf.mxu0  ;;  %1620 = vmatpush3.bf16.msra.mxu1 %v1711_v19 }
 0x197   : > { %1613 = vmatprep.subr.bf16.mxu1 %v1712_v20 }
 0x198   : > { %v1539_v30 = vpop.f32.mrf.mxu0 }
 0x199   : > { %v812_v32 = vpack.c.bf16 %v1539_v30, %v1538_v28 }
 0x19a   : > { %v765_v6 = vpop.f32.mrf.mxu0  ;;  %1621 = vmatpush3.bf16.msra.mxu1 %v1712_v20 }
 0x19b   : > { %v811_v31 = vpack.c.bf16 %v765_v6, %v762_v29  ;;  %1614 = vmatprep.subr.bf16.mxu1 %v1713_v8 }
 0x19d   : > { %1568 = vmatprep.mubr.bf16.mxu1 %v811_v31 }
 0x19e   : > { %1569 = vmatmul.mubr.bf16.gmra.mxu1 %v812_v32 }
 0x19f   : > { %1622 = vmatpush3.bf16.msra.mxu1 %v1713_v8 }
 0x1a0   : > { %1615 = vmatprep.subr.bf16.mxu1 %v1714_v12 }
 0x1a3   : > { %1623 = vmatpush3.bf16.msra.mxu1 %v1714_v12 }
 0x1a4   : > { %1616 = vmatprep.subr.bf16.mxu1 %v1715_v21 }
 0x1a7   : > { %1624 = vmatpush3.bf16.msra.mxu1 %v1715_v21 }
 0x1a8   : > { %1617 = vmatprep.subr.bf16.mxu1 %v1716_v40 }
 0x1ab   : > { %1625 = vmatpush3.bf16.msra.mxu1 %v1716_v40 }
 0x1ac   : > { %1618 = vmatprep.subr.bf16.mxu1 %v1717_v41 }
 0x1af   : > { %1626 = vmatpush3.bf16.msra.mxu1 %v1717_v41 }
 0x1b0   : > { %1619 = vmatprep.subr.bf16.mxu1 %v1718_v44 }
 0x1b3   : > { %1627 = vmatpush3.bf16.msra.mxu1 %v1718_v44 }
 0x1b9   : > { %v1542_v34 = vpop.f32.mrf.mxu0 }
 0x1bb   : > { %v778_v36 = vpop.f32.mrf.mxu0 }
 0x1bd   : > { %v1543_v33 = vpop.f32.mrf.mxu0 }
 0x1be   : > { %v814_v39 = vpack.c.bf16 %v1543_v33, %v1542_v34 }
 0x1bf   : > { %v781_v37 = vpop.f32.mrf.mxu0 }
 0x1c0   : > { %v813_v38 = vpack.c.bf16 %v781_v37, %v778_v36 }
 0x1c2   : > { %1572 = vmatprep.mubr.bf16.mxu1 %v813_v38 }
 0x1c3   : > { %1573 = vmatmul.mubr.bf16.gmra.mxu1 %v814_v39 }
 0x1da   : > { %v1546_v42 = vpop.f32.mrf.mxu0 }
 0x1dc   : > { %v794_v43 = vpop.f32.mrf.mxu0 }
 0x1de   : > { %v1547_v45 = vpop.f32.mrf.mxu0 }
 0x1df   : > { %v816_v48 = vpack.c.bf16 %v1547_v45, %v1546_v42  ;;  %v2196_v42 = vld [vmem:[%s2291_s5] ss:$0 sm:$0xff] }
 0x1e0   : > { %v797_v46 = vpop.f32.mrf.mxu0 }
 0x1e1   : > { %v815_v47 = vpack.c.bf16 %v797_v46, %v794_v43 }
 0x1e3   : > { %1576 = vmatprep.mubr.bf16.mxu1 %v815_v47 }
 0x1e4   : > { %1577 = vmatmul.mubr.bf16.gmra.mxu1 %v816_v48 }
 0x255   : > { %v1566_v49 = vpop.f32.mrf.mxu1 }
 0x256   : > { %v931_v55 = vadd.f32 %v1566_v49, %v1428_v51 }
 0x257   : > { %v922_v50 = vpop.f32.mrf.mxu1 }
 0x258   : > { %v923_v53 = vadd.f32 %v1428_v51, %v922_v50  ;;  %v987_v61 = vmax.f32 %v931_v55, 0.0 }
 0x259   : > { %v1567_v52 = vpop.f32.mrf.mxu1 }
 0x25a   : > { %v934_v54 = vadd.f32 %v1567_v52, %v1428_v51  ;;  %v985_v58 = vmax.f32 %v923_v53, 0.0 }
 0x25b   : > { %v925_v56 = vpop.f32.mrf.mxu1 }
 0x25c   : > { %v926_v57 = vadd.f32 %v1428_v51, %v925_v56  ;;  %v988_v35 = vmax.f32 %v934_v54, 0.0 }
 0x25e   : > { %v986_v59 = vmax.f32 %v926_v57, 0.0  ;;  %v1570_v60 = vpop.f32.mrf.mxu1  ;;  %v1002_v0 = vpack.c.bf16 %v988_v35, %v987_v61 }
 0x25f   : > { %v947_v5 = vadd.f32 %v1570_v60, %v1428_v51 }
 0x260   : > { %v1001_v62 = vpack.c.bf16 %v986_v59, %v985_v58  ;;  %v938_v63 = vpop.f32.mrf.mxu1 }
 0x261   : > { %v939_v1 = vadd.f32 %v1428_v51, %v938_v63  ;;  %v991_v13 = vmax.f32 %v947_v5, 0.0 }
 0x262   : > { %v1571_v2 = vpop.f32.mrf.mxu1  ;;  %1596 = vmatprep.mubr.bf16.mxu0 %v1001_v62 }
 0x263   : > { %v950_v4 = vadd.f32 %v1571_v2, %v1428_v51  ;;  %1597 = vmatmul.mubr.bf16.vlgmr.msra.gmra.mxu0 %v1002_v0  ;;  %v989_v10 = vmax.f32 %v939_v1, 0.0 }
 0x264   : > { %v941_v3 = vpop.f32.mrf.mxu1 }
 0x265   : > { %v942_v7 = vadd.f32 %v1428_v51, %v941_v3  ;;  %v992_v9 = vmax.f32 %v950_v4, 0.0 }
 0x267   : > { %v990_v11 = vmax.f32 %v942_v7, 0.0  ;;  %v1004_v15 = vpack.c.bf16 %v992_v9, %v991_v13 }
 0x269   : > { %v1003_v14 = vpack.c.bf16 %v990_v11, %v989_v10 }
 0x26b   : > { %1600 = vmatprep.mubr.bf16.mxu0 %v1003_v14 }
 0x26c   : > { %1601 = vmatmul.mubr.bf16.gmra.mxu0 %v1004_v15 }
 0x283   : > { %v1574_v16 = vpop.f32.mrf.mxu1 }
 0x284   : > { %v963_v8 = vadd.f32 %v1574_v16, %v1428_v51 }
 0x285   : > { %v954_v17 = vpop.f32.mrf.mxu1 }
 0x286   : > { %v955_v19 = vadd.f32 %v1428_v51, %v954_v17  ;;  %v995_v25 = vmax.f32 %v963_v8, 0.0 }
 0x287   : > { %v1575_v18 = vpop.f32.mrf.mxu1 }
 0x288   : > { %v966_v20 = vadd.f32 %v1575_v18, %v1428_v51  ;;  %v993_v23 = vmax.f32 %v955_v19, 0.0 }
 0x289   : > { %v957_v12 = vpop.f32.mrf.mxu1 }
 0x28a   : > { %v958_v21 = vadd.f32 %v1428_v51, %v957_v12  ;;  %v996_v22 = vmax.f32 %v966_v20, 0.0 }
 0x28c   : > { %v994_v24 = vmax.f32 %v958_v21, 0.0  ;;  %v1006_v27 = vpack.c.bf16 %v996_v22, %v995_v25 }
 0x28e   : > { %v1005_v26 = vpack.c.bf16 %v994_v24, %v993_v23 }
 0x290   : > { %1604 = vmatprep.mubr.bf16.mxu1 %v1005_v26 }
 0x291   : > { %1605 = vmatmul.mubr.bf16.vlgmr.msra.gmra.mxu1 %v1006_v27 }
 0x2a4   : > { %v1578_v28 = vpop.f32.mrf.mxu1 }
 0x2a5   : > { %v979_v32 = vadd.f32 %v1578_v28, %v1428_v51 }
 0x2a6   : > { %v970_v29 = vpop.f32.mrf.mxu1 }
 0x2a7   : > { %v971_v6 = vadd.f32 %v1428_v51, %v970_v29  ;;  %v999_v39 = vmax.f32 %v979_v32, 0.0 }
 0x2a8   : > { %v1579_v30 = vpop.f32.mrf.mxu1 }
 0x2a9   : > { %v982_v31 = vadd.f32 %v1579_v30, %v1428_v51  ;;  %v997_v37 = vmax.f32 %v971_v6, 0.0 }
 0x2aa   : > { %v973_v34 = vpop.f32.mrf.mxu1 }
 0x2ab   : > { %v974_v36 = vadd.f32 %v1428_v51, %v973_v34  ;;  %v1000_v33 = vmax.f32 %v982_v31, 0.0 }
 0x2ad   : > { %v998_v38 = vmax.f32 %v974_v36, 0.0  ;;  %v1008_v41 = vpack.c.bf16 %v1000_v33, %v999_v39 }
 0x2af   : > { %v1007_v40 = vpack.c.bf16 %v998_v38, %v997_v37 }
 0x2b1   : > { %1608 = vmatprep.mubr.bf16.mxu1 %v1007_v40 }
 0x2b2   : > { %1609 = vmatmul.mubr.bf16.gmra.mxu1 %v1008_v41 }
 0x323   : > { %v1598_v43 = vpop.f32.mrf.mxu0 }
 0x324   : > { %v1123_v44 = vadd.f32 %v1598_v43, %v2196_v42 }
 0x325   : > { %v1114_v45 = vpop.f32.mrf.mxu0 }
 0x326   : > { %v1448_v46 = vmul.f32 -1.442695, %v1123_v44  ;;  %v1115_v47 = vadd.f32 %v2196_v42, %v1114_v45 }
 0x327   : > { %v1599_v48 = vpop.f32.mrf.mxu0 }
 0x328   : > { %1719 = vpow2.f32 %v1448_v46  ;;  %v1446_v49 = vmul.f32 -1.442695, %v1115_v47  ;;  %v1126_v50 = vadd.f32 %v1599_v48, %v2196_v42 }
 0x329   : > { %v1117_v51 = vpop.f32.mrf.mxu0 }
 0x32a   : > { %1721 = vpow2.f32 %v1446_v49  ;;  %v1449_v52 = vmul.f32 -1.442695, %v1126_v50  ;;  %v1118_v53 = vadd.f32 %v2196_v42, %v1117_v51 }
 0x32c   : > { %1723 = vpow2.f32 %v1449_v52  ;;  %v1447_v54 = vmul.f32 -1.442695, %v1118_v53  ;;  %v1602_v55 = vpop.f32.mrf.mxu0 }
 0x32d   : > { %v1139_v56 = vadd.f32 %v1602_v55, %v2196_v42 }
 0x32e   : > { %1725 = vpow2.f32 %v1447_v54  ;;  %v1130_v57 = vpop.f32.mrf.mxu0 }
 0x32f   : > { %v1452_v35 = vmul.f32 -1.442695, %v1139_v56  ;;  %v1131_v58 = vadd.f32 %v2196_v42, %v1130_v57 }
 0x330   : > { %v1603_v59 = vpop.f32.mrf.mxu0 }
 0x331   : > { %1727 = vpow2.f32 %v1452_v35  ;;  %v1450_v60 = vmul.f32 -1.442695, %v1131_v58  ;;  %v1142_v61 = vadd.f32 %v1603_v59, %v2196_v42 }
 0x332   : > { %v1133_v62 = vpop.f32.mrf.mxu0 }
 0x333   : > { %1729 = vpow2.f32 %v1450_v60  ;;  %v1453_v63 = vmul.f32 -1.442695, %v1142_v61  ;;  %v1134_v0 = vadd.f32 %v2196_v42, %v1133_v62 }
 0x335   : > { %v1720_v2 = vpop.eup %1719  ;;  %1731 = vpow2.f32 %v1453_v63  ;;  %v1451_v1 = vmul.f32 -1.442695, %v1134_v0 }
 0x336   : > { %v1227_v4 = vadd.f32 1.0, %v1720_v2 }
 0x337   : > { %v1722_v5 = vpop.eup %1721  ;;  %1733 = vpow2.f32 %v1451_v1 }
 0x338   : > { %1735 = vrcp.f32 %v1227_v4  ;;  %v1225_v3 = vadd.f32 1.0, %v1722_v5 }
 0x339   : > { %v1724_v7 = vpop.eup %1723 }
 0x33a   : > { %1737 = vrcp.f32 %v1225_v3  ;;  %v1228_v9 = vadd.f32 1.0, %v1724_v7 }
 0x33b   : > { %v1726_v10 = vpop.eup %1725 }
 0x33c   : > { %1739 = vrcp.f32 %v1228_v9  ;;  %v1226_v11 = vadd.f32 1.0, %v1726_v10 }
 0x33e   : > { %v1728_v13 = vpop.eup %1727  ;;  %1741 = vrcp.f32 %v1226_v11 }
 0x33f   : > { %v1231_v14 = vadd.f32 1.0, %v1728_v13 }
 0x340   : > { %v1730_v15 = vpop.eup %1729 }
 0x341   : > { %1743 = vrcp.f32 %v1231_v14  ;;  %v1229_v16 = vadd.f32 1.0, %v1730_v15 }
 0x342   : > { %v1732_v17 = vpop.eup %1731 }
 0x343   : > { %1745 = vrcp.f32 %v1229_v16  ;;  %v1232_v18 = vadd.f32 1.0, %v1732_v17 }
 0x344   : > { %v1734_v19 = vpop.eup %1733 }
 0x345   : > { %v1736_v20 = vpop.eup %1735  ;;  %1747 = vrcp.f32 %v1232_v18  ;;  %v1230_v8 = vadd.f32 1.0, %v1734_v19 }
 0x346   : > { %1275 = vst [vmem:[%s2209_s29 + $0x10] sm:$0xff] %v1736_v20 }
 0x347   : > { %v1738_v12 = vpop.eup %1737  ;;  %1749 = vrcp.f32 %v1230_v8 }
 0x348   : > { %1273 = vst [vmem:[%s2209_s29] sm:$0xff] %v1738_v12 }
 0x349   : > { %v1740_v21 = vpop.eup %1739 }
 0x34a   : > { %1276 = vst [vmem:[%s2209_s29 + $0x18] sm:$0xff] %v1740_v21 }
 0x34b   : > { %v1742_v22 = vpop.eup %1741 }
 0x34c   : > { %1274 = vst [vmem:[%s2209_s29 + $0x8] sm:$0xff] %v1742_v22 }
 0x34e   : > { %v1744_v23 = vpop.eup %1743 }
 0x34f   : > { %1279 = vst [vmem:[%s2209_s29 + $0x30] sm:$0xff] %v1744_v23 }
 0x350   : > { %v1746_v24 = vpop.eup %1745 }
 0x351   : > { %1277 = vst [vmem:[%s2209_s29 + $0x20] sm:$0xff] %v1746_v24  ;;  %v1606_v25 = vpop.f32.mrf.mxu1 }
 0x352   : > { %v1748_v26 = vpop.eup %1747  ;;  %v1155_v27 = vadd.f32 %v1606_v25, %v2196_v42 }
 0x353   : > { %1280 = vst [vmem:[%s2209_s29 + $0x38] sm:$0xff] %v1748_v26  ;;  %v1146_v28 = vpop.f32.mrf.mxu1 }
 0x354   : > { %v1750_v29 = vpop.eup %1749  ;;  %v1456_v30 = vmul.f32 -1.442695, %v1155_v27  ;;  %v1147_v6 = vadd.f32 %v2196_v42, %v1146_v28 }
 0x355   : > { %1278 = vst [vmem:[%s2209_s29 + $0x28] sm:$0xff] %v1750_v29  ;;  %v1607_v31 = vpop.f32.mrf.mxu1 }
 0x356   : > { %1751 = vpow2.f32 %v1456_v30  ;;  %v1454_v32 = vmul.f32 -1.442695, %v1147_v6  ;;  %v1158_v34 = vadd.f32 %v1607_v31, %v2196_v42 }
 0x357   : > { %v1149_v36 = vpop.f32.mrf.mxu1 }
 0x358   : > { %1753 = vpow2.f32 %v1454_v32  ;;  %v1457_v33 = vmul.f32 -1.442695, %v1158_v34  ;;  %v1150_v37 = vadd.f32 %v2196_v42, %v1149_v36 }
 0x35a   : > { %1755 = vpow2.f32 %v1457_v33  ;;  %v1455_v38 = vmul.f32 -1.442695, %v1150_v37 }
 0x35c   : > { %1757 = vpow2.f32 %v1455_v38 }
 0x363   : > { %v1752_v39 = vpop.eup %1751 }
 0x364   : > { %v1235_v40 = vadd.f32 1.0, %v1752_v39 }
 0x365   : > { %v1754_v41 = vpop.eup %1753 }
 0x366   : > { %1759 = vrcp.f32 %v1235_v40  ;;  %v1233_v43 = vadd.f32 1.0, %v1754_v41 }
 0x367   : > { %v1756_v44 = vpop.eup %1755 }
 0x368   : > { %1761 = vrcp.f32 %v1233_v43  ;;  %v1236_v45 = vadd.f32 1.0, %v1756_v44 }
 0x369   : > { %v1758_v46 = vpop.eup %1757 }
 0x36a   : > { %1763 = vrcp.f32 %v1236_v45  ;;  %v1234_v47 = vadd.f32 1.0, %v1758_v46 }
 0x36c   : > { %1765 = vrcp.f32 %v1234_v47 }
 0x372   : > { %v1610_v48 = vpop.f32.mrf.mxu1 }
 0x373   : > { %v1760_v49 = vpop.eup %1759  ;;  %v1171_v50 = vadd.f32 %v1610_v48, %v2196_v42 }
 0x374   : > { %1283 = vst [vmem:[%s2209_s29 + $0x50] sm:$0xff] %v1760_v49  ;;  %v1162_v51 = vpop.f32.mrf.mxu1 }
 0x375   : > { %v1762_v52 = vpop.eup %1761  ;;  %v1460_v53 = vmul.f32 -1.442695, %v1171_v50  ;;  %v1163_v54 = vadd.f32 %v2196_v42, %v1162_v51 }
 0x376   : > { %1281 = vst [vmem:[%s2209_s29 + $0x40] sm:$0xff] %v1762_v52  ;;  %v1611_v55 = vpop.f32.mrf.mxu1 }
 0x377   : > { %v1764_v56 = vpop.eup %1763  ;;  %1767 = vpow2.f32 %v1460_v53  ;;  %v1458_v57 = vmul.f32 -1.442695, %v1163_v54  ;;  %v1174_v35 = vadd.f32 %v1611_v55, %v2196_v42 }
 0x378   : > { %1284 = vst [vmem:[%s2209_s29 + $0x58] sm:$0xff] %v1764_v56  ;;  %v1165_v58 = vpop.f32.mrf.mxu1 }
 0x379   : > { %v1766_v59 = vpop.eup %1765  ;;  %1769 = vpow2.f32 %v1458_v57  ;;  %v1461_v60 = vmul.f32 -1.442695, %v1174_v35  ;;  %v1166_v61 = vadd.f32 %v2196_v42, %v1165_v58 }
 0x37a   : > { %1282 = vst [vmem:[%s2209_s29 + $0x48] sm:$0xff] %v1766_v59 }
 0x37b   : > { %1771 = vpow2.f32 %v1461_v60  ;;  %v1459_v62 = vmul.f32 -1.442695, %v1166_v61 }
 0x37d   : > { %1773 = vpow2.f32 %v1459_v62 }
 0x384   : > { %v1768_v63 = vpop.eup %1767 }
 0x385   : > { %v1239_v0 = vadd.f32 1.0, %v1768_v63 }
 0x386   : > { %v1770_v2 = vpop.eup %1769 }
 0x387   : > { %1775 = vrcp.f32 %v1239_v0  ;;  %v1237_v1 = vadd.f32 1.0, %v1770_v2 }
 0x388   : > { %v1772_v4 = vpop.eup %1771 }
 0x389   : > { %1777 = vrcp.f32 %v1237_v1  ;;  %v1240_v5 = vadd.f32 1.0, %v1772_v4 }
 0x38a   : > { %v1774_v3 = vpop.eup %1773 }
 0x38b   : > { %1779 = vrcp.f32 %v1240_v5  ;;  %v1238_v42 = vadd.f32 1.0, %v1774_v3 }
 0x38d   : > { %1781 = vrcp.f32 %v1238_v42 }
 0x394   : > { %v1776_v7 = vpop.eup %1775 }
 0x395   : > { %1287 = vst [vmem:[%s2209_s29 + $0x70] sm:$0xff] %v1776_v7 }
 0x396   : > { %v1778_v9 = vpop.eup %1777 }
 0x397   : > { %1285 = vst [vmem:[%s2209_s29 + $0x60] sm:$0xff] %v1778_v9 }
 0x398   : > { %v1780_v10 = vpop.eup %1779 }
 0x399   : > { %1288 = vst [vmem:[%s2209_s29 + $0x78] sm:$0xff] %v1780_v10 }
 0x39a   : > { %v1782_v11 = vpop.eup %1781 }
 0x39b   : > { %1286 = vst [vmem:[%s2209_s29 + $0x68] sm:$0xff] %v1782_v11 }
 0x39c   : > { %1796 = shalt.err (!%p1793_p3)
}
 0x39d   : > { %s1797_s18 = scalar_lea.hbm %s2238_s14, 2048  ;;  %s1801_s26 = scalar_lea.hbm %s2292_s6, 4096 }
 0x39e   : > { %p1798_p4 = scmp.ne.s32.totalorder %s2238_s14, %s1797_s18  ;;  %p1802_p9 = scmp.lt.s32.totalorder %s2238_s14, %s2292_s6 }
 0x39f   : > { %p1803_p10 = scmp.lt.s32.totalorder %s1801_s26, %s1797_s18 }
 0x3a0   : > { %p1799_p7 = pnand %p1798_p4, %p1925_p5 }
 0x3a1   : > { %p1804_p11 = por %p1803_p10, %p1802_p9 }
 0x3a2   : > { %p1800_p8 = pneg %p1799_p7 }
 0x3a4   : > { %p1805_p12 = pnand %p1804_p11, %p1800_p8 }
 0x3a6   : > { %1808 = shalt.err (!%p1805_p12)
}
 0x3a7   : > { %s1850_s9 = smov 128   ;;  %s1851_s11 = smov 8  }
 0x3a8   : > { %1628 = dma.vmem_to_hbm [thread:$0]  (%p1925_p5), %s2240_s10, 2048, %s2238_s14, %s2246_s15, %s1850_s9, %s1850_s9, %s1851_s11  }
 0x3a9 PF: > { %p1634_p13 = scmp.ge.s32.totalorder %s1843_s24, 2  ;;  %s1318_s12 = sand.u32 1, %s1831_s21  }
 0x3aa   : > { %s1319_s25 = scalar_lea.sflag [#allocation3], %s1318_s12 }
 0x3ab   : > { %p1631_p0 = pnand %p1634_p13, %p1929_p6 }
 0x3ad   : > { %p1632_p1 = pneg %p1631_p0 }
 0x3af   : > { %1826 = dma.done.wait (%p1632_p1), %s1319_s25, 2048  }
 0x3b0   : > { %1828 = vsyncadd (%p1632_p1), %s1319_s25, 4294965248  ;;  %p16_p2 = scmp.ge.s32.totalorder %s1912_s27, 4   ;;  %s2295_s21 = smov %s1835_s22 }
 0x3b1   : > { %s2296_s22 = smov %s1839_s23  ;;  %s2297_s23 = smov %s1923_s30 }
 0x3b2   : > { %s2298_s24 = smov %s1912_s27  ;;  %18 = sbr.rel (!%p16_p2) target bundleno = 3 (0x3), region = 79 }
 0x3b7   :  { %1324 = vsyncpa [#allocation3], 1 }
 0x3b8   :  { %1326 = vsyncpa [#allocation3 + $0x1], 1 }

</bundles_post_ra>
